<compile_context>
chip_gen: v5e
topology: v5e:2x2
jax: 0.10.0
libtpu: 0.0.40
codegen_flags: <defaults>
</compile_context>

<pallas_src>
import jax
import jax.numpy as jnp
from jax.experimental import pallas as pl
from jax.experimental.pallas import tpu as pltpu


def _my_loss_kernel(x_ref, lab_col_ref, lab_row_ref, out_ref):
    # x_ref:       (TR, N) logits tile (native dtype)
    # lab_col_ref: (TR, 1) i32 labels for the rows of this tile
    # lab_row_ref: (1, N)  i32 labels for all columns (full-resident)
    # out_ref:     (TR, 1) f32 per-row partial loss for this tile
    x = x_ref[...].astype(jnp.float32)                       # (TR, N)
    eq = lab_col_ref[...] == lab_row_ref[...]                # (TR, N) bool

    # Numerically-stable logsumexp pieces (no full log_softmax materialized):
    # log_softmax[i, j] = x[i, j] - (row_max_i + lse_i)
    row_max = jnp.max(x, axis=1, keepdims=True)              # (TR, 1)
    lse = jnp.log(jnp.sum(jnp.exp(x - row_max), axis=1, keepdims=True))

    # sum_j -target[i,j] * log_softmax[i,j]
    #   = count_i * (row_max_i + lse_i) - sum_j [eq] * x[i,j]
    count = jnp.sum(eq.astype(jnp.float32), axis=1, keepdims=True)      # (TR, 1)
    masked_sum = jnp.sum(jnp.where(eq, x, 0.0), axis=1, keepdims=True)  # (TR, 1)

    out_ref[...] = count * (row_max + lse) - masked_sum


def _pick_row_tile(n, itemsize, vmem_budget_bytes=32 * 1024 * 1024):
    """Largest row tile (multiple of 8, divides n) whose double-buffered
    logits footprint fits the budget; falls back to the full array."""
    for tr in (1024, 512, 256, 128, 64, 32, 16, 8):
        if tr <= n and n % tr == 0 and 2 * tr * n * itemsize <= vmem_budget_bytes:
            return tr
    return n


def my_loss(x, label, tr=None):
    """x: (N, N) logits (any float dtype), label: (N,) int labels -> scalar f32."""
    n = x.shape[0]
    assert x.shape == (n, n), "My_LOSS requires square logits (C == N)"

    itemsize = jnp.dtype(x.dtype).itemsize
    if tr is None:
        tr = _pick_row_tile(n, itemsize)
    assert n % tr == 0, f"row tile {tr} must divide N={n}"
    num_tiles = n // tr

    lab = label.astype(jnp.int32)
    lab_col = lab.reshape(n, 1)
    lab_row = lab.reshape(1, n)

    # Scoped VMEM: double-buffered logits tile + f32 working copy + small
    # label/output tiles, capped at v7x's 64 MiB physical VMEM.
    vmem_bytes = 2 * tr * n * itemsize + 3 * tr * n * 4 + (2 << 20)
    vmem_bytes = max(vmem_bytes, 16 * 1024 * 1024)
    vmem_bytes = min(vmem_bytes, 64 * 1024 * 1024)

    per_row = pl.pallas_call(
        _my_loss_kernel,
        out_shape=jax.ShapeDtypeStruct((n, 1), jnp.float32),
        grid_spec=pltpu.PrefetchScalarGridSpec(
            num_scalar_prefetch=0,
            grid=(num_tiles,),
            in_specs=[
                pl.BlockSpec((tr, 1 * n), lambda i: (i, 0)),   # logits row tile
                pl.BlockSpec((tr, 1), lambda i: (i, 0)),       # labels (rows)
                pl.BlockSpec((1, n), lambda i: (0, 0)),        # labels (cols)
            ],
            out_specs=pl.BlockSpec((tr, 1), lambda i: (i, 0)), # per-row partials
        ),
        compiler_params=pltpu.CompilerParams(
            dimension_semantics=("parallel",),
            vmem_limit_bytes=int(vmem_bytes),
        ),
    )(x, lab_col, lab_row)

    # Tiny final reduction + mean in plain JAX (multiply by precomputed 1/N).
    return jnp.sum(per_row) * jnp.float32(1.0 / n)


def _my_loss_ref(x, label):
    """Pure-JAX reference mirroring the PyTorch module."""
    target = (label[:, None] == label[None, :]).astype(jnp.float32)
    log_sm = jax.nn.log_softmax(x.astype(jnp.float32), axis=1)
    return jnp.mean(jnp.sum(-target * log_sm, axis=1))


if __name__ == "__main__":
    key = jax.random.PRNGKey(0)
    k_x, k_l = jax.random.split(key)

    N = 256  # batch == num classes (square logits, as the forward implies)
    x = jax.random.normal(k_x, (N, N), dtype=jnp.float32)
    label = jax.random.randint(k_l, (N,), 0, 8, dtype=jnp.int32)

    # tr=128 -> 2 row-tiles: exercises the pipelined grid path even at small N.
    loss = my_loss(x, label, tr=128)
    jax.block_until_ready(loss)

    ref = _my_loss_ref(x, label)
    assert jnp.allclose(loss, ref, rtol=1e-4, atol=1e-4), (loss, ref)

    print("KERNEL_OK")
</pallas_src>

<mosaic_0001>
module attributes {stable_mosaic.version = 11 : i64} {
  func.func @_my_loss_kernel(%arg0: i32, %arg1: memref<128x256xf32, #tpu.memory_space<vmem>>, %arg2: memref<128x1xi32, #tpu.memory_space<vmem>>, %arg3: memref<1x256xi32, #tpu.memory_space<vmem>>, %arg4: memref<128x1xf32, #tpu.memory_space<vmem>>) attributes {dimension_semantics = [#tpu.dimension_semantics<parallel>], iteration_bounds = array<i64: 2>, scalar_prefetch = 0 : i64, scratch_operands = 0 : i64, tpu.core_type = #tpu.core_type<tc>, window_params = [{transform_indices = @transform_0, window_bounds = array<i64: 128, 256>}, {transform_indices = @transform_1, window_bounds = array<i64: 128, 1>}, {pipeline_mode = #tpu.pipeline_mode<synchronous>, transform_indices = @transform_2, window_bounds = array<i64: 1, 256>}, {transform_indices = @transform_3, window_bounds = array<i64: 128, 1>}]} {
    %c0 = arith.constant 0 : index
    %c0_0 = arith.constant 0 : index
    %0 = vector.load %arg1[%c0, %c0_0] : memref<128x256xf32, #tpu.memory_space<vmem>>, vector<128x256xf32>
    %c0_1 = arith.constant 0 : index
    %c0_2 = arith.constant 0 : index
    %1 = vector.load %arg2[%c0_1, %c0_2] : memref<128x1xi32, #tpu.memory_space<vmem>>, vector<128x1xi32>
    %c0_3 = arith.constant 0 : index
    %c0_4 = arith.constant 0 : index
    %2 = vector.load %arg3[%c0_3, %c0_4] : memref<1x256xi32, #tpu.memory_space<vmem>>, vector<1x256xi32>
    %3 = vector.broadcast %1 : vector<128x1xi32> to vector<128x256xi32>
    %4 = vector.broadcast %2 : vector<1x256xi32> to vector<128x256xi32>
    %5 = arith.cmpi eq, %3, %4 : vector<128x256xi32>
    %cst = arith.constant dense<0xFF800000> : vector<128xf32>
    %6 = vector.multi_reduction <maximumf>, %0, %cst [1] : vector<128x256xf32> to vector<128xf32>
    %7 = vector.shape_cast %6 : vector<128xf32> to vector<128x1xf32>
    %8 = vector.broadcast %7 : vector<128x1xf32> to vector<128x256xf32>
    %9 = arith.subf %0, %8 : vector<128x256xf32>
    %10 = math.exp %9 : vector<128x256xf32>
    %cst_5 = arith.constant dense<0.000000e+00> : vector<128xf32>
    %11 = vector.multi_reduction <add>, %10, %cst_5 [1] : vector<128x256xf32> to vector<128xf32>
    %12 = vector.shape_cast %11 : vector<128xf32> to vector<128x1xf32>
    %13 = math.log %12 : vector<128x1xf32>
    %14 = arith.extui %5 : vector<128x256xi1> to vector<128x256xi32>
    %15 = arith.sitofp %14 : vector<128x256xi32> to vector<128x256xf32>
    %cst_6 = arith.constant dense<0.000000e+00> : vector<128xf32>
    %16 = vector.multi_reduction <add>, %15, %cst_6 [1] : vector<128x256xf32> to vector<128xf32>
    %17 = vector.shape_cast %16 : vector<128xf32> to vector<128x1xf32>
    %cst_7 = arith.constant 0.000000e+00 : f32
    %18 = vector.broadcast %cst_7 : f32 to vector<128x256xf32>
    %19 = arith.select %5, %0, %18 : vector<128x256xi1>, vector<128x256xf32>
    %cst_8 = arith.constant dense<0.000000e+00> : vector<128xf32>
    %20 = vector.multi_reduction <add>, %19, %cst_8 [1] : vector<128x256xf32> to vector<128xf32>
    %21 = vector.shape_cast %20 : vector<128xf32> to vector<128x1xf32>
    %22 = arith.addf %7, %13 : vector<128x1xf32>
    %23 = arith.mulf %17, %22 : vector<128x1xf32>
    %24 = arith.subf %23, %21 : vector<128x1xf32>
    %c0_9 = arith.constant 0 : index
    %c0_10 = arith.constant 0 : index
    %25 = vector.load %arg4[%c0_9, %c0_10] : memref<128x1xf32, #tpu.memory_space<vmem>>, vector<128x1xf32>
    tpu.vector_store %arg4[%c0_9, %c0_10], %24 {strides = array<i32>} : memref<128x1xf32, #tpu.memory_space<vmem>>, vector<128x1xf32>,
    return
  }
  func.func @transform_0(%arg0: i32) -> (i32, i32) {
    %c0_i32 = arith.constant 0 : i32
    %c0_i32_0 = arith.constant 0 : i32
    return %arg0, %c0_i32 : i32, i32
  }
  func.func @transform_1(%arg0: i32) -> (i32, i32) {
    %c0_i32 = arith.constant 0 : i32
    %c0_i32_0 = arith.constant 0 : i32
    return %arg0, %c0_i32 : i32, i32
  }
  func.func @transform_2(%arg0: i32) -> (i32, i32) {
    %c0_i32 = arith.constant 0 : i32
    %c0_i32_0 = arith.constant 0 : i32
    %c0_i32_1 = arith.constant 0 : i32
    return %c0_i32, %c0_i32_0 : i32, i32
  }
  func.func @transform_3(%arg0: i32) -> (i32, i32) {
    %c0_i32 = arith.constant 0 : i32
    %c0_i32_0 = arith.constant 0 : i32
    return %arg0, %c0_i32 : i32, i32
  }
}

</mosaic_0001>

<bundles_post_ra>
// kernel: tpu_custom_call.1
= control target key start
LH: loop header
LB: loop body
LE: loop exit
PB: predicated region body
PF: predicated region fallthrough
CT: control target
= control target key end

     0   :  { %8 = vsyncpa [#allocation3], 0  ;;  %s1999_s0 = inlined_call_operand.hbm [shape: f32[256,256], index: 0, kind: input, shape index: {}]   ;;  %s2000_s1 = inlined_call_operand.vmem [shape: s32[256,1], index: 1, kind: input, shape index: {}]   ;;  %s2001_s2 = inlined_call_operand.vmem [shape: s32[1,256], index: 2, kind: input, shape index: {}]   ;;  %s2002_s3 = inlined_call_operand.vmem [shape: f32[256,1], index: 3, kind: output, shape index: {}]  }
   0x1   :  { %10 = vsyncpa [#allocation3 + $0x1], 0  ;;  %s1191_s12 = smov 0   ;;  %s1193_s13 = smov 0  }
   0x2   :  { %s1195_s14 = smov 0   ;;  %s1197_s15 = smov 0  }
   0x3 LB: > { %s909_s16 = sadd.s32 4294967295, %s1165_s15   ;;  %s1211_s17 = sadd.s32 1, %s1165_s15   ;;  %s1165_s15 = sphi %s1197_s15, %s2098_s15   ;;  %s1161_s14 = sphi %s1195_s14, %s2097_s14   ;;  %s1157_s13 = sphi %s1193_s13, %s2096_s13   ;;  %s1153_s12 = sphi %s1191_s12, %s2095_s12  }
   0x4   : > { %s20_s18 = ssub.s32 %s1165_s15, %s1211_s17  ;;  %s23_s19 = sadd.s32 1, %s1161_s14 }
   0x5   : > { %p21_p0 = scmp.eq.s32.totalorder %s20_s18, 0  ;;  %p30_p1 = scmp.ne.s32.totalorder %s1161_s14, %s1157_s13 }
   0x6   : > { %p31_p2 = scmp.eq.s32.totalorder %s1165_s15, 0  ;;  %p36_p3 = scmp.ne.s32.totalorder %s1157_s13, %s1153_s12 }
   0x7   : > { %s1221_s20 = scalar_select %p21_p0, %s1161_s14, %s23_s19  }
   0x8   : > { %p1223_p4 = por %p31_p2, %p30_p1  ;;  %p37_p5 = scmp.eq.s32.totalorder %s909_s16, 0 }
   0x9   : > { %p965_p6 = scmp.lt.s32.totalorder %s1165_s15, 2  ;;  %s136_s23 = sand.u32 1, %s1161_s14  }
   0xa   : > { %p1230_p7 = por %p37_p5, %p36_p3  ;;  %s913_s24 = sshll.u32 %s136_s23, 8 }
   0xb   : > { %s958_s25 = sshll.u32 %s1165_s15, 8  ;;  %s140_s29 = scalar_lea.vmem [#allocation2], %s913_s24 }
   0xc   : > { %s146_s28 = scalar_lea.hbm %s1999_s0, %s958_s25  ;;  %s149_s30 = sshll.u32 %s140_s29, 4  ;;  %s150_s30 = int_to_ptr.vmem [resolvable:$true] %s149_s30 }
   0xd   : > { %s147_s4 = sshll.u32 %s146_s28, 4  ;;  %p1241_p8 = pnand %p965_p6, %p1223_p4  ;;  %s148_s4 = int_to_ptr.hbm [resolvable:$true] %s147_s4 }
   0xe   : > { %p917_p9 = scmp.ge.s32.totalorder %s1165_s15, 1  ;;  %s137_s6 = scalar_lea.sflag [#allocation3], %s136_s23 }
   0xf   : > { %s1101_s7 = sshra.s32 %s148_s4, 4  ;;  %p1105_p11 = pneg %p1241_p8  ;;  %s1102_s7 = int_to_ptr.hbm [resolvable:$true] %s1101_s7 }
  0x10   : > { %s1103_s8 = scalar_lea.hbm %s1102_s7, 256  ;;  %s1108_s11 = scalar_lea.hbm %s1999_s0, 512 }
  0x11   : > { %p1104_p10 = scmp.ne.s32.totalorder %s1102_s7, %s1103_s8  ;;  %p1109_p0 = scmp.lt.s32.totalorder %s1102_s7, %s1999_s0 }
  0x12   : > { %p1110_p1 = scmp.lt.s32.totalorder %s1108_s11, %s1103_s8 }
  0x13   : > { %p1106_p12 = pnand %p1105_p11, %p1104_p10 }
  0x14   : > { %p1111_p2 = por %p1110_p1, %p1109_p0 }
  0x15   : > { %p1107_p13 = pneg %p1106_p12 }
  0x17   : > { %p1112_p3 = pnand %p1111_p2, %p1107_p13 }
  0x19   : > { %1115 = shalt.err (!%p1112_p3)
}
  0x1a   : > { %s1167_s19 = smov 256   ;;  %s1168_s21 = smov 16  }
  0x1b   : > { %964 = dma.hbm_to_vmem [thread:$0]  (!%p1241_p8), %s148_s4, 4096, %s150_s30, %s137_s6, %s1167_s19, %s1167_s19, %s1168_s21  }
  0x1c   : > { %p166_p4 = scmp.lt.s32.totalorder %s1165_s15, 3 }
  0x1e   : > { %p167_p5 = pnand %p917_p9, %p166_p4 }
  0x20   : > { %170 = sbr.rel (%p167_p5) target bundleno = 500 (0x1f4), region = 32 }
  0x25   : > { %s172_s23 = sand.u32 1, %s1157_s13  }
  0x26   : > { %s918_s24 = sshll.u32 %s172_s23, 8  ;;  %s173_s25 = scalar_lea.sflag [#allocation3], %s172_s23 }
  0x27   : > { %s1260_s26 = scalar_lea.vmem [#allocation2], %s918_s24 }
  0x28   : > { %1148 = dma.done.wait (%p1230_p7), %s173_s25, 4096  }
  0x29   : > { %1150 = vsyncadd (%p1230_p7), %s173_s25, 4294963200  ;;  %s919_s27 = sshll.u32 %s909_s16, 4  ;;  %v1169_v0 = vmov 0   ;;  %v1295_v17 = vld [vmem:[%s1260_s26 + $0x10] sm:$0xff]  ;;  %v1298_v18 = vld [vmem:[%s1260_s26 + $0x18] sm:$0xff] }
  0x2a   : > { %1004 = vset.pattern.permute.xlu2 %v1169_v0  ;;  %1003 = vset.pattern.permute.xlu1 %v1169_v0  ;;  %p207_p6 = scmp.lt.s32.totalorder %s919_s27, 31  ;;  %v1301_v19 = vld [vmem:[%s1260_s26] sm:$0xff]  ;;  %v1304_v20 = vld [vmem:[%s1260_s26 + $0x8] sm:$0xff]  ;;  %v352_v21 = vmax.f32 %v1295_v17, %v1298_v18  ;;  %v1311_v23 = vld [vmem:[%s1260_s26 + $0x30] sm:$0xff] }
  0x2b   : > { %1002 = vset.pattern.permute.xlu0 %v1169_v0  ;;  %v349_v22 = vmax.f32 %v1301_v19, %v1304_v20  ;;  %2041 = vst [vmem:[#allocation5_spill] sm:$0xff] %v1311_v23  ;;  %v1314_v24 = vld [vmem:[%s1260_s26 + $0x38] sm:$0xff]  ;;  %v1317_v25 = vld [vmem:[%s1260_s26 + $0x40] sm:$0xff]  ;;  %v1320_v26 = vld [vmem:[%s1260_s26 + $0x48] sm:$0xff] }
  0x2c   : > { %s2100_s27 = smov (!%p207_p6, %s919_s27), 31  ;;  %2042 = vst [vmem:[#allocation6_spill] sm:$0xff] %v1314_v24  ;;  %v1323_v27 = vld [vmem:[%s1260_s26 + $0x20] sm:$0xff]  ;;  %v1326_v28 = vld [vmem:[%s1260_s26 + $0x28] sm:$0xff]  ;;  %v358_v29 = vmax.f32 %v1311_v23, %v1314_v24  ;;  %v361_v30 = vmax.f32 %v1317_v25, %v1320_v26  ;;  %v1335_v32 = vld [vmem:[%s1260_s26 + $0x50] sm:$0xff] }
  0x2d   : > { %s920_s28 = sshll.u32 %s2100_s27, 3  ;;  %2043 = vst [vmem:[#allocation7_spill] sm:$0xff] %v1317_v25  ;;  %v355_v31 = vmax.f32 %v1323_v27, %v1326_v28  ;;  %v1338_v33 = vld [vmem:[%s1260_s26 + $0x58] sm:$0xff]  ;;  %v1341_v34 = vld [vmem:[%s1260_s26 + $0x70] sm:$0xff]  ;;  %v1347_v36 = vld [vmem:[%s1260_s26 + $0x60] sm:$0xff] }
  0x2e   : > { %s1276_s4 = scalar_lea.vmem %s2000_s1, %s920_s28  ;;  %2044 = vst [vmem:[#allocation8_spill] sm:$0xff] %v1320_v26  ;;  %v1344_v35 = vld [vmem:[%s1260_s26 + $0x78] sm:$0xff]  ;;  %v1350_v37 = vld [vmem:[%s1260_s26 + $0x68] sm:$0xff]  ;;  %v364_v38 = vmax.f32 %v1335_v32, %v1338_v33  ;;  %v1359_v41 = vld [vmem:[%s1260_s26 + $0x80] sm:$0xff]  ;;  %s1921_s6 = scalar_lea.vmem %s2002_s3, %s920_s28 }
  0x2f   : > { %v254_v1 = vld [vmem:[%s1276_s4 + $0x20] sm:$0xff]  ;;  %v252_v2 = vld [vmem:[%s1276_s4 + $0x10] sm:$0xff]  ;;  %v255_v4 = vld [vmem:[%s1276_s4 + $0x28] sm:$0xff]  ;;  %2045 = vst [vmem:[#allocation9_spill] sm:$0xff] %v1341_v34  ;;  %v370_v39 = vmax.f32 %v1341_v34, %v1344_v35  ;;  %v367_v40 = vmax.f32 %v1347_v36, %v1350_v37 }
  0x30   : > { %v250_v3 = vld [vmem:[%s1276_s4] sm:$0xff]  ;;  %280 = vperm.xlu2 %1004, %v254_v1   ;;  %274 = vperm.xlu1 %1003, %v252_v2   ;;  %v253_v5 = vld [vmem:[%s1276_s4 + $0x18] sm:$0xff]  ;;  %v251_v6 = vld [vmem:[%s1276_s4 + $0x8] sm:$0xff]  ;;  %2046 = vst [vmem:[#allocation10_spill] sm:$0xff] %v1344_v35 }
  0x31   : > { %268 = vperm.xlu0 %1002, %v250_v3   ;;  %v258_v7 = vld [vmem:[%s1276_s4 + $0x40] sm:$0xff]  ;;  %v257_v8 = vld [vmem:[%s1276_s4 + $0x38] sm:$0xff]  ;;  %v256_v9 = vld [vmem:[%s1276_s4 + $0x30] sm:$0xff] }
  0x32   : > { %v261_v10 = vld [vmem:[%s1276_s4 + $0x58] sm:$0xff]  ;;  %v260_v11 = vld [vmem:[%s1276_s4 + $0x50] sm:$0xff]  ;;  %v259_v12 = vld [vmem:[%s1276_s4 + $0x48] sm:$0xff] }
  0x33   : > { %v264_v13 = vld [vmem:[%s1276_s4 + $0x70] sm:$0xff]  ;;  %v263_v14 = vld [vmem:[%s1276_s4 + $0x68] sm:$0xff]  ;;  %v262_v15 = vld [vmem:[%s1276_s4 + $0x60] sm:$0xff] }
  0x34   : > { %v265_v16 = vld [vmem:[%s1276_s4 + $0x78] sm:$0xff]  ;;  %v1362_v42 = vld [vmem:[%s1260_s26 + $0x88] sm:$0xff]  ;;  %v1365_v43 = vld [vmem:[%s1260_s26 + $0xa0] sm:$0xff] }
  0x35   : > { %v1368_v44 = vld [vmem:[%s1260_s26 + $0xa8] sm:$0xff]  ;;  %v1371_v45 = vld [vmem:[%s1260_s26 + $0x90] sm:$0xff]  ;;  %v1374_v46 = vld [vmem:[%s1260_s26 + $0x98] sm:$0xff]  ;;  %v373_v47 = vmax.f32 %v1359_v41, %v1362_v42 }
  0x36   : > { %v379_v48 = vmax.f32 %v1365_v43, %v1368_v44  ;;  %v376_v49 = vmax.f32 %v1371_v45, %v1374_v46  ;;  %v1383_v50 = vld [vmem:[%s1260_s26 + $0xb0] sm:$0xff]  ;;  %v1386_v51 = vld [vmem:[%s1260_s26 + $0xb8] sm:$0xff]  ;;  %v1395_v54 = vld [vmem:[%s1260_s26 + $0xc0] sm:$0xff] }
  0x37   : > { %v1389_v52 = vld [vmem:[%s1260_s26 + $0xd0] sm:$0xff]  ;;  %v1392_v53 = vld [vmem:[%s1260_s26 + $0xd8] sm:$0xff]  ;;  %v1398_v55 = vld [vmem:[%s1260_s26 + $0xc8] sm:$0xff]  ;;  %v382_v56 = vmax.f32 %v1383_v50, %v1386_v51 }
  0x38   : > { %283 = vperm.xlu2 %1004, %v255_v4   ;;  %277 = vperm.xlu1 %1003, %v253_v5   ;;  %v388_v57 = vmax.f32 %v1389_v52, %v1392_v53  ;;  %v385_v58 = vmax.f32 %v1395_v54, %v1398_v55  ;;  %v1407_v59 = vld [vmem:[%s1260_s26 + $0xe0] sm:$0xff]  ;;  %v1410_v60 = vld [vmem:[%s1260_s26 + $0xe8] sm:$0xff]  ;;  %v1413_v61 = vld [vmem:[%s1260_s26 + $0xf0] sm:$0xff] }
  0x39   : > { %271 = vperm.xlu0 %1002, %v251_v6   ;;  %v1416_v62 = vld [vmem:[%s1260_s26 + $0xf8] sm:$0xff]  ;;  %v391_v63 = vmax.f32 %v1407_v59, %v1410_v60 }
  0x3a   : > { %v394_v0 = vmax.f32 %v1413_v61, %v1416_v62 }
  0x40   : > { %292 = vperm.xlu2 %1004, %v258_v7   ;;  %289 = vperm.xlu1 %1003, %v257_v8  }
  0x41   : > { %286 = vperm.xlu0 %1002, %v256_v9  }
  0x48   : > { %301 = vperm.xlu2 %1004, %v261_v10   ;;  %298 = vperm.xlu1 %1003, %v260_v11  }
  0x49   : > { %295 = vperm.xlu0 %1002, %v259_v12  }
  0x50   : > { %310 = vperm.xlu2 %1004, %v264_v13   ;;  %307 = vperm.xlu1 %1003, %v263_v14  }
  0x51   : > { %304 = vperm.xlu0 %1002, %v262_v15  }
  0x59   : > { %313 = vperm.xlu0 %1002, %v265_v16  }
  0x79   : > { %353 = vmax.xlane.f32.xlu2 %v352_v21 }
  0x7a   : > { %350 = vmax.xlane.f32.xlu1 %v349_v22 }
  0x81   : > { %359 = vmax.xlane.f32.xlu2 %v358_v29 }
  0x82   : > { %362 = vmax.xlane.f32.xlu1 %v361_v30 }
  0x83   : > { %356 = vmax.xlane.f32.xlu0 %v355_v31 }
  0x89   : > { %365 = vmax.xlane.f32.xlu2 %v364_v38 }
  0x8a   : > { %371 = vmax.xlane.f32.xlu1 %v370_v39  ;;  %v1422_v1 = vpop.permute.xlu2 %280 }
  0x8b   : > { %368 = vmax.xlane.f32.xlu0 %v367_v40 }
  0x91   : > { %374 = vmax.xlane.f32.xlu2 %v373_v47 }
  0x92   : > { %380 = vmax.xlane.f32.xlu1 %v379_v48  ;;  %v1428_v4 = vpop.permute.xlu2 %283 }
  0x93   : > { %377 = vmax.xlane.f32.xlu0 %v376_v49 }
  0x99   : > { %383 = vmax.xlane.f32.xlu2 %v382_v56 }
  0x9a   : > { %389 = vmax.xlane.f32.xlu1 %v388_v57  ;;  %v1434_v7 = vpop.permute.xlu2 %292 }
  0x9b   : > { %386 = vmax.xlane.f32.xlu0 %v385_v58 }
  0xa1   : > { %392 = vmax.xlane.f32.xlu2 %v391_v63 }
  0xa2   : > { %v1426_v3 = vpop.permute.xlu1 %274  ;;  %v1440_v10 = vpop.permute.xlu2 %301 }
  0xa3   : > { %395 = vmax.xlane.f32.xlu0 %v394_v0  ;;  %v1424_v2 = vpop.permute.xlu0 %268 }
  0xaa   : > { %v1432_v6 = vpop.permute.xlu1 %277  ;;  %v1446_v13 = vpop.permute.xlu2 %310 }
  0xab   : > { %v1430_v5 = vpop.permute.xlu0 %271 }
  0xb2   : > { %v1438_v9 = vpop.permute.xlu1 %289 }
  0xb3   : > { %v1436_v8 = vpop.permute.xlu0 %286 }
  0xba   : > { %v1444_v12 = vpop.permute.xlu1 %298 }
  0xbb   : > { %v1442_v11 = vpop.permute.xlu0 %295 }
  0xc2   : > { %v1450_v15 = vpop.permute.xlu1 %307 }
  0xc3   : > { %v1448_v14 = vpop.permute.xlu0 %304 }
  0xcb   : > { %v1460_v30 = vpop.permute.xlu0 %313 }
  0xec   : > { %v1452_v16 = vpop.xlane.xlu2 %353 }
  0xed   : > { %2047 = vst [vmem:[#allocation11_spill] sm:$0xff] %v1452_v16  ;;  %v399_v21 = vsub.f32 %v1295_v17, %v1452_v16  ;;  %v400_v22 = vsub.f32 %v1298_v18, %v1452_v16  ;;  %v1458_v29 = vpop.xlane.xlu1 %350 }
  0xee   : > { %2048 = vst [vmem:[#allocation12_spill] sm:$0xff] %v1458_v29  ;;  %v397_v31 = vsub.f32 %v1301_v19, %v1458_v29  ;;  %v398_v38 = vsub.f32 %v1304_v20, %v1458_v29 }
  0xef   : > { %v433_v39 = vmul.f32 1.442695, %v399_v21  ;;  %v435_v40 = vmul.f32 1.442695, %v400_v22 }
  0xf0   : > { %v429_v47 = vmul.f32 1.442695, %v397_v31  ;;  %v431_v48 = vmul.f32 1.442695, %v398_v38 }
  0xf1   : > { %1005 = vpow2.f32 %v433_v39 }
  0xf2   : > { %1007 = vpow2.f32 %v435_v40 }
  0xf3   : > { %1009 = vpow2.f32 %v429_v47 }
  0xf4   : > { %1011 = vpow2.f32 %v431_v48  ;;  %v1466_v49 = vpop.xlane.xlu2 %359 }
  0xf5   : > { %2049 = vst [vmem:[#allocation13_spill] sm:$0xff] %v1466_v49  ;;  %v403_v56 = vsub.f32 %v1311_v23, %v1466_v49  ;;  %v404_v57 = vsub.f32 %v1314_v24, %v1466_v49  ;;  %v1472_v58 = vpop.xlane.xlu1 %362 }
  0xf6   : > { %2050 = vst [vmem:[#allocation14_spill] sm:$0xff] %v1472_v58  ;;  %v1474_v63 = vpop.xlane.xlu0 %356  ;;  %v405_v0 = vsub.f32 %v1317_v25, %v1472_v58  ;;  %v406_v21 = vsub.f32 %v1320_v26, %v1472_v58 }
  0xf7   : > { %2051 = vst [vmem:[#allocation15_spill] sm:$0xff] %v1474_v63  ;;  %v1006_v22 = vpop.eup %1005  ;;  %v401_v31 = vsub.f32 %v1323_v27, %v1474_v63  ;;  %v402_v38 = vsub.f32 %v1326_v28, %v1474_v63  ;;  %v441_v39 = vmul.f32 1.442695, %v403_v56  ;;  %v443_v40 = vmul.f32 1.442695, %v404_v57 }
  0xf8   : > { %v1008_v47 = vpop.eup %1007  ;;  %v445_v48 = vmul.f32 1.442695, %v405_v0  ;;  %v447_v23 = vmul.f32 1.442695, %v406_v21 }
  0xf9   : > { %v1010_v49 = vpop.eup %1009  ;;  %v437_v16 = vmul.f32 1.442695, %v401_v31  ;;  %v439_v29 = vmul.f32 1.442695, %v402_v38  ;;  %1013 = vpow2.f32 %v441_v39  ;;  %v496_v24 = vadd.f32 %v1008_v47, %v1006_v22 }
  0xfa   : > { %v1012_v25 = vpop.eup %1011  ;;  %1015 = vpow2.f32 %v443_v40 }
  0xfb   : > { %1017 = vpow2.f32 %v437_v16  ;;  %497 = vadd.xlane.f32.xlu2 %v496_v24  ;;  %v493_v58 = vadd.f32 %v1012_v25, %v1010_v49 }
  0xfc   : > { %1019 = vpow2.f32 %v439_v29  ;;  %v1484_v26 = vpop.xlane.xlu2 %365 }
  0xfd   : > { %2052 = vst [vmem:[#allocation16_spill] sm:$0xff] %v1484_v26  ;;  %1021 = vpow2.f32 %v445_v48  ;;  %494 = vadd.xlane.f32.xlu1 %v493_v58  ;;  %v407_v56 = vsub.f32 %v1335_v32, %v1484_v26  ;;  %v408_v57 = vsub.f32 %v1338_v33, %v1484_v26  ;;  %v1490_v0 = vpop.xlane.xlu1 %371 }
  0xfe   : > { %2053 = vst [vmem:[#allocation17_spill] sm:$0xff] %v1490_v0  ;;  %1023 = vpow2.f32 %v447_v23  ;;  %v1492_v22 = vpop.xlane.xlu0 %368  ;;  %v411_v24 = vsub.f32 %v1341_v34, %v1490_v0  ;;  %v412_v25 = vsub.f32 %v1344_v35, %v1490_v0 }
  0xff   : > { %2054 = vst [vmem:[#allocation18_spill] sm:$0xff] %v1492_v22  ;;  %v1014_v16 = vpop.eup %1013  ;;  %v409_v29 = vsub.f32 %v1347_v36, %v1492_v22  ;;  %v410_v49 = vsub.f32 %v1350_v37, %v1492_v22  ;;  %v449_v58 = vmul.f32 1.442695, %v407_v56  ;;  %v451_v21 = vmul.f32 1.442695, %v408_v57 }
 0x100   : > { %v1016_v31 = vpop.eup %1015  ;;  %v457_v38 = vmul.f32 1.442695, %v411_v24  ;;  %v459_v26 = vmul.f32 1.442695, %v412_v25 }
 0x101   : > { %v1018_v23 = vpop.eup %1017  ;;  %v453_v39 = vmul.f32 1.442695, %v409_v29  ;;  %v455_v40 = vmul.f32 1.442695, %v410_v49  ;;  %1025 = vpow2.f32 %v449_v58  ;;  %v502_v47 = vadd.f32 %v1016_v31, %v1014_v16 }
 0x102   : > { %v1020_v48 = vpop.eup %1019  ;;  %1027 = vpow2.f32 %v451_v21 }
 0x103   : > { %v1022_v0 = vpop.eup %1021  ;;  %1029 = vpow2.f32 %v453_v39  ;;  %v499_v63 = vadd.f32 %v1020_v48, %v1018_v23 }
 0x104   : > { %v1024_v35 = vpop.eup %1023  ;;  %1031 = vpow2.f32 %v455_v40  ;;  %v1502_v34 = vpop.xlane.xlu2 %374 }
 0x105   : > { %2055 = vst [vmem:[#allocation19_spill] sm:$0xff] %v1502_v34  ;;  %1033 = vpow2.f32 %v457_v38  ;;  %500 = vadd.xlane.f32.xlu0 %v499_v63  ;;  %503 = vadd.xlane.f32.xlu1 %v502_v47  ;;  %v505_v56 = vadd.f32 %v1024_v35, %v1022_v0  ;;  %v413_v57 = vsub.f32 %v1359_v41, %v1502_v34  ;;  %v1508_v16 = vpop.xlane.xlu1 %380 }
 0x106   : > { %v414_v24 = vsub.f32 %v1362_v42, %v1502_v34  ;;  %2056 = vst [vmem:[#allocation20_spill] sm:$0xff] %v1508_v16  ;;  %1035 = vpow2.f32 %v459_v26  ;;  %v1510_v25 = vpop.xlane.xlu0 %377  ;;  %v417_v29 = vsub.f32 %v1365_v43, %v1508_v16  ;;  %v418_v49 = vsub.f32 %v1368_v44, %v1508_v16 }
 0x107   : > { %2057 = vst [vmem:[#allocation21_spill] sm:$0xff] %v1510_v25  ;;  %v1026_v63 = vpop.eup %1025  ;;  %506 = vadd.xlane.f32.xlu2 %v505_v56  ;;  %v415_v35 = vsub.f32 %v1371_v45, %v1510_v25  ;;  %v416_v0 = vsub.f32 %v1374_v46, %v1510_v25  ;;  %v461_v58 = vmul.f32 1.442695, %v413_v57 }
 0x108   : > { %v463_v21 = vmul.f32 1.442695, %v414_v24  ;;  %v1028_v31 = vpop.eup %1027  ;;  %v469_v26 = vmul.f32 1.442695, %v417_v29  ;;  %v471_v48 = vmul.f32 1.442695, %v418_v49 }
 0x109   : > { %v1030_v38 = vpop.eup %1029  ;;  %v465_v23 = vmul.f32 1.442695, %v415_v35  ;;  %v467_v39 = vmul.f32 1.442695, %v416_v0  ;;  %1037 = vpow2.f32 %v461_v58  ;;  %v508_v40 = vadd.f32 %v1028_v31, %v1026_v63 }
 0x10a   : > { %v1032_v47 = vpop.eup %1031  ;;  %1039 = vpow2.f32 %v463_v21 }
 0x10b   : > { %v1034_v16 = vpop.eup %1033  ;;  %1041 = vpow2.f32 %v465_v23  ;;  %v511_v56 = vadd.f32 %v1032_v47, %v1030_v38 }
 0x10c   : > { %v1036_v34 = vpop.eup %1035  ;;  %1043 = vpow2.f32 %v467_v39  ;;  %v1520_v22 = vpop.xlane.xlu2 %383 }
 0x10d   : > { %2058 = vst [vmem:[#allocation22_spill] sm:$0xff] %v1520_v22  ;;  %1045 = vpow2.f32 %v469_v26  ;;  %509 = vadd.xlane.f32.xlu0 %v508_v40  ;;  %512 = vadd.xlane.f32.xlu1 %v511_v56  ;;  %v514_v57 = vadd.f32 %v1036_v34, %v1034_v16  ;;  %v419_v24 = vsub.f32 %v1383_v50, %v1520_v22  ;;  %v1526_v63 = vpop.xlane.xlu1 %389 }
 0x10e   : > { %v420_v29 = vsub.f32 %v1386_v51, %v1520_v22  ;;  %2059 = vst [vmem:[#allocation23_spill] sm:$0xff] %v1526_v63  ;;  %1047 = vpow2.f32 %v471_v48  ;;  %v1528_v49 = vpop.xlane.xlu0 %386  ;;  %v423_v35 = vsub.f32 %v1389_v52, %v1526_v63  ;;  %v424_v0 = vsub.f32 %v1392_v53, %v1526_v63 }
 0x10f   : > { %v1038_v58 = vpop.eup %1037  ;;  %515 = vadd.xlane.f32.xlu2 %v514_v57  ;;  %v421_v34 = vsub.f32 %v1395_v54, %v1528_v49  ;;  %v422_v16 = vsub.f32 %v1398_v55, %v1528_v49  ;;  %v473_v21 = vmul.f32 1.442695, %v419_v24 }
 0x110   : > { %v475_v31 = vmul.f32 1.442695, %v420_v29  ;;  %v1040_v26 = vpop.eup %1039  ;;  %v481_v38 = vmul.f32 1.442695, %v423_v35  ;;  %v483_v56 = vmul.f32 1.442695, %v424_v0 }
 0x111   : > { %v1042_v23 = vpop.eup %1041  ;;  %v477_v39 = vmul.f32 1.442695, %v421_v34  ;;  %v479_v40 = vmul.f32 1.442695, %v422_v16  ;;  %1049 = vpow2.f32 %v473_v21  ;;  %v517_v47 = vadd.f32 %v1040_v26, %v1038_v58 }
 0x112   : > { %v1044_v48 = vpop.eup %1043  ;;  %1051 = vpow2.f32 %v475_v31 }
 0x113   : > { %v1046_v63 = vpop.eup %1045  ;;  %1053 = vpow2.f32 %v477_v39  ;;  %v520_v57 = vadd.f32 %v1044_v48, %v1042_v23 }
 0x114   : > { %v1048_v22 = vpop.eup %1047  ;;  %1055 = vpow2.f32 %v479_v40  ;;  %v1538_v25 = vpop.xlane.xlu2 %392  ;;  %v266_v40 = vld [vmem:[%s2001_s2] sm:$0x3] }
 0x115   : > { %1057 = vpow2.f32 %v481_v38  ;;  %518 = vadd.xlane.f32.xlu0 %v517_v47  ;;  %521 = vadd.xlane.f32.xlu1 %v520_v57  ;;  %v523_v24 = vadd.f32 %v1048_v22, %v1046_v63  ;;  %v425_v29 = vsub.f32 %v1407_v59, %v1538_v25  ;;  %v426_v35 = vsub.f32 %v1410_v60, %v1538_v25 }
 0x116   : > { %1059 = vpow2.f32 %v483_v56  ;;  %v1544_v58 = vpop.xlane.xlu0 %395  ;;  %v1553_v57 = vperm.slane %v266_v40, 0 }
 0x117   : > { %v1050_v0 = vpop.eup %1049  ;;  %524 = vadd.xlane.f32.xlu2 %v523_v24  ;;  %v427_v34 = vsub.f32 %v1413_v61, %v1544_v58  ;;  %v428_v16 = vsub.f32 %v1416_v62, %v1544_v58  ;;  %v485_v21 = vmul.f32 1.442695, %v425_v29  ;;  %v487_v31 = vmul.f32 1.442695, %v426_v35 }
 0x118   : > { %v1052_v22 = vpop.eup %1051  ;;  %v1555_v24 = vperm.slane %v266_v40, 1  ;;  %vm317_vm0 = vcmp.eq.s32.totalorder %v1424_v2, %v1553_v57  ;;  %vm321_vm2 = vcmp.eq.s32.totalorder %v1426_v3, %v1553_v57  ;;  %vm319_vm4 = vcmp.eq.s32.totalorder %v1430_v5, %v1553_v57 }
 0x119   : > { %v1054_v63 = vpop.eup %1053  ;;  %v489_v26 = vmul.f32 1.442695, %v427_v34  ;;  %v491_v38 = vmul.f32 1.442695, %v428_v16  ;;  %1061 = vpow2.f32 %v485_v21  ;;  %v526_v23 = vadd.f32 %v1052_v22, %v1050_v0 }
 0x11a   : > { %v1056_v39 = vpop.eup %1055  ;;  %1063 = vpow2.f32 %v487_v31  ;;  %vm318_vm1 = vcmp.eq.s32.totalorder %v1424_v2, %v1555_v24  ;;  %v1170_v31 = vmov 0.0   ;;  %vm322_vm3 = vcmp.eq.s32.totalorder %v1426_v3, %v1555_v24  ;;  %v2063_v3 = vld [vmem:[#allocation8_spill] sm:$0xff] }
 0x11b   : > { %v1058_v47 = vpop.eup %1057  ;;  %1065 = vpow2.f32 %v489_v26  ;;  %v529_v48 = vadd.f32 %v1056_v39, %v1054_v63  ;;  %v923_v22 = vsel %vm317_vm0, 1.0, %v1170_v31  ;;  %v924_v63 = vsel %vm318_vm1, 1.0, %v1170_v31 }
 0x11c   : > { %v1060_v56 = vpop.eup %1059  ;;  %1067 = vpow2.f32 %v491_v38  ;;  %vm320_vm5 = vcmp.eq.s32.totalorder %v1430_v5, %v1555_v24  ;;  %v637_v38 = vadd.f32 %v924_v63, %v923_v22  ;;  %vm323_vm6 = vcmp.eq.s32.totalorder %v1432_v6, %v1553_v57  ;;  %v2061_v5 = vld [vmem:[#allocation6_spill] sm:$0xff] }
 0x11d   : > { %527 = vadd.xlane.f32.xlu0 %v526_v23  ;;  %530 = vadd.xlane.f32.xlu1 %v529_v48  ;;  %v532_v29 = vadd.f32 %v1060_v56, %v1058_v47  ;;  %vm324_vm7 = vcmp.eq.s32.totalorder %v1432_v6, %v1555_v24  ;;  %v925_v23 = vsel %vm319_vm4, 1.0, %v1170_v31  ;;  %v926_v39 = vsel %vm320_vm5, 1.0, %v1170_v31 }
 0x11e   : > { %v927_v40 = vsel %vm321_vm2, 1.0, %v1170_v31  ;;  %v928_v47 = vsel %vm322_vm3, 1.0, %v1170_v31  ;;  %v929_v48 = vsel %vm323_vm6, 1.0, %v1170_v31  ;;  %v930_v56 = vsel %vm324_vm7, 1.0, %v1170_v31 }
 0x11f   : > { %v1062_v35 = vpop.eup %1061  ;;  %533 = vadd.xlane.f32.xlu2 %v532_v29  ;;  %v640_v29 = vadd.f32 %v926_v39, %v925_v23  ;;  %vm325_vm8 = vcmp.eq.s32.totalorder %v1422_v1, %v1553_v57  ;;  %vm326_vm9 = vcmp.eq.s32.totalorder %v1422_v1, %v1555_v24  ;;  %vm2023_vm10 = vcmp.eq.s32.totalorder %v1428_v4, %v1553_v57 }
 0x120   : > { %v1064_v0 = vpop.eup %1063  ;;  %vm2022_vm11 = vcmp.eq.s32.totalorder %v1428_v4, %v1555_v24  ;;  %vm2025_vm12 = vcmp.eq.s32.totalorder %v1436_v8, %v1553_v57  ;;  %vm2024_vm13 = vcmp.eq.s32.totalorder %v1436_v8, %v1555_v24  ;;  %vm2026_vm14 = vcmp.eq.s32.totalorder %v1434_v7, %v1553_v57 }
 0x121   : > { %v1066_v34 = vpop.eup %1065  ;;  %v535_v16 = vadd.f32 %v1064_v0, %v1062_v35  ;;  %v643_v35 = vadd.f32 %v928_v47, %v927_v40  ;;  %v646_v0 = vadd.f32 %v930_v56, %v929_v48  ;;  %v934_v22 = vsel %vm2022_vm11, 1.0, %v1170_v31 }
 0x122   : > { %v1068_v21 = vpop.eup %1067  ;;  %v935_v63 = vsel %vm2025_vm12, 1.0, %v1170_v31  ;;  %vm2028_vm15 = vcmp.eq.s32.totalorder %v1434_v7, %v1555_v24  ;;  %vm2029_vm11 = vcmp.eq.s32.totalorder %v1438_v9, %v1553_v57  ;;  %vm2030_vm12 = vcmp.eq.s32.totalorder %v1442_v11, %v1555_v24 }
 0x123   : > { %v538_v26 = vadd.f32 %v1068_v21, %v1066_v34  ;;  %v931_v34 = vsel %vm325_vm8, 1.0, %v1170_v31  ;;  %v933_v21 = vsel %vm2023_vm10, 1.0, %v1170_v31  ;;  %vm2027_vm10 = vcmp.eq.s32.totalorder %v1438_v9, %v1555_v24 }
 0x124   : > { %v652_v23 = vadd.f32 %v934_v22, %v933_v21  ;;  %v937_v40 = vsel %vm2029_vm11, 1.0, %v1170_v31  ;;  %v938_v47 = vsel %vm2027_vm10, 1.0, %v1170_v31  ;;  %v939_v48 = vsel %vm2026_vm14, 1.0, %v1170_v31 }
 0x125   : > { %536 = vadd.xlane.f32.xlu0 %v535_v16  ;;  %539 = vadd.xlane.f32.xlu1 %v538_v26  ;;  %v932_v16 = vsel %vm326_vm9, 1.0, %v1170_v31  ;;  %v936_v26 = vsel %vm2024_vm13, 1.0, %v1170_v31  ;;  %vm2031_vm13 = vcmp.eq.s32.totalorder %v1442_v11, %v1553_v57  ;;  %v940_v56 = vsel %vm2028_vm15, 1.0, %v1170_v31 }
 0x126   : > { %v655_v39 = vadd.f32 %v936_v26, %v935_v63  ;;  %vm2032_vm14 = vcmp.eq.s32.totalorder %v1440_v10, %v1553_v57  ;;  %vm2034_vm10 = vcmp.eq.s32.totalorder %v1440_v10, %v1555_v24  ;;  %vm2035_vm15 = vcmp.eq.s32.totalorder %v1444_v12, %v1553_v57 }
 0x127   : > { %638 = vadd.xlane.f32.xlu2 %v637_v38  ;;  %v649_v38 = vadd.f32 %v932_v16, %v931_v34  ;;  %v661_v34 = vadd.f32 %v940_v56, %v939_v48  ;;  %vm2033_vm11 = vcmp.eq.s32.totalorder %v1444_v12, %v1555_v24  ;;  %v943_v21 = vsel %vm2035_vm15, 1.0, %v1170_v31 }
 0x128   : > { %v944_v22 = vsel %vm2033_vm11, 1.0, %v1170_v31  ;;  %v945_v63 = vsel %vm2032_vm14, 1.0, %v1170_v31  ;;  %v946_v26 = vsel %vm2034_vm10, 1.0, %v1170_v31  ;;  %vm345_vm14 = vcmp.eq.s32.totalorder %v1446_v13, %v1553_v57 }
 0x129   : > { %vm346_vm11 = vcmp.eq.s32.totalorder %v1446_v13, %v1555_v24  ;;  %vm343_vm10 = vcmp.eq.s32.totalorder %v1450_v15, %v1553_v57  ;;  %vm344_vm15 = vcmp.eq.s32.totalorder %v1450_v15, %v1555_v24 }
 0x12a   : > { %v949_v48 = vsel %vm343_vm10, 1.0, %v1170_v31  ;;  %v950_v56 = vsel %vm344_vm15, 1.0, %v1170_v31 }
 0x12d   : > { %641 = vadd.xlane.f32.xlu0 %v640_v29  ;;  %644 = vadd.xlane.f32.xlu1 %v643_v35  ;;  %v941_v29 = vsel %vm2031_vm13, 1.0, %v1170_v31  ;;  %v942_v35 = vsel %vm2030_vm12, 1.0, %v1170_v31  ;;  %vm2037_vm12 = vcmp.eq.s32.totalorder %v1448_v14, %v1553_v57  ;;  %vm2036_vm13 = vcmp.eq.s32.totalorder %v1448_v14, %v1555_v24 }
 0x12e   : > { %v664_v16 = vadd.f32 %v942_v35, %v941_v29  ;;  %v951_v29 = vsel %vm345_vm14, 1.0, %v1170_v31  ;;  %v952_v35 = vsel %vm346_vm11, 1.0, %v1170_v31 }
 0x12f   : > { %647 = vadd.xlane.f32.xlu2 %v646_v0  ;;  %v658_v0 = vadd.f32 %v938_v47, %v937_v40  ;;  %v670_v40 = vadd.f32 %v946_v26, %v945_v63  ;;  %v685_v63 = vsel %vm317_vm0, %v1301_v19, 0.0  ;;  %v686_v26 = vsel %vm318_vm1, %v1304_v20, 0.0 }
 0x130   : > { %v689_v19 = vsel %vm321_vm2, %v1323_v27, 0.0  ;;  %v690_v20 = vsel %vm322_vm3, %v1326_v28, 0.0  ;;  %v717_v2 = vadd.f32 %v686_v26, %v685_v63  ;;  %v692_v27 = vsel %vm324_vm7, %v2061_v5, 0.0 }
 0x131   : > { %vm2064_vm0 = vcmp.eq.s32.totalorder %v1428_v4, %v1553_v57  ;;  %vm2065_vm1 = vcmp.eq.s32.totalorder %v1428_v4, %v1555_v24  ;;  %vm2066_vm2 = vcmp.eq.s32.totalorder %v1436_v8, %v1553_v57  ;;  %vm2067_vm3 = vcmp.eq.s32.totalorder %v1436_v8, %v1555_v24  ;;  %v2070_v4 = vld [vmem:[#allocation10_spill] sm:$0xff] }
 0x132   : > { %v696_v6 = vsel %vm2065_vm1, %v1338_v33, 0.0  ;;  %v697_v1 = vsel %vm2066_vm2, %v1347_v36, 0.0  ;;  %vm2073_vm7 = vcmp.eq.s32.totalorder %v1434_v7, %v1555_v24  ;;  %vm2077_vm1 = vcmp.eq.s32.totalorder %v1444_v12, %v1555_v24 }
 0x133   : > { %vm2078_vm2 = vcmp.eq.s32.totalorder %v1440_v10, %v1553_v57 }
 0x135   : > { %650 = vadd.xlane.f32.xlu0 %v649_v38  ;;  %653 = vadd.xlane.f32.xlu1 %v652_v23  ;;  %v947_v38 = vsel %vm2037_vm12, 1.0, %v1170_v31  ;;  %v948_v23 = vsel %vm2036_vm13, 1.0, %v1170_v31  ;;  %vm347_vm13 = vcmp.eq.s32.totalorder %v1460_v30, %v1553_v57  ;;  %vm348_vm12 = vcmp.eq.s32.totalorder %v1460_v30, %v1555_v24 }
 0x136   : > { %v673_v47 = vadd.f32 %v948_v23, %v947_v38  ;;  %v688_v38 = vsel %vm320_vm5, %v1298_v18, 0.0  ;;  %vm2071_vm5 = vcmp.eq.s32.totalorder %v1438_v9, %v1555_v24 }
 0x137   : > { %656 = vadd.xlane.f32.xlu2 %v655_v39  ;;  %v667_v39 = vadd.f32 %v944_v22, %v943_v21  ;;  %v679_v21 = vadd.f32 %v952_v35, %v951_v29 }
 0x13d   : > { %659 = vadd.xlane.f32.xlu0 %v658_v0  ;;  %662 = vadd.xlane.f32.xlu1 %v661_v34  ;;  %v953_v0 = vsel %vm347_vm13, 1.0, %v1170_v31  ;;  %v954_v34 = vsel %vm348_vm12, 1.0, %v1170_v31  ;;  %v687_v31 = vsel %vm319_vm4, %v1295_v17, 0.0  ;;  %v723_v17 = vadd.f32 %v690_v20, %v689_v19 }
 0x13e   : > { %v682_v22 = vadd.f32 %v954_v34, %v953_v0  ;;  %v720_v23 = vadd.f32 %v688_v38, %v687_v31  ;;  %v2068_v0 = vld [vmem:[#allocation9_spill] sm:$0xff]  ;;  %vm2069_vm4 = vcmp.eq.s32.totalorder %v1438_v9, %v1553_v57  ;;  %v700_v34 = vsel %vm2071_vm5, %v2070_v4, 0.0 }
 0x13f   : > { %665 = vadd.xlane.f32.xlu2 %v664_v16  ;;  %v676_v16 = vadd.f32 %v950_v56, %v949_v48  ;;  %v695_v48 = vsel %vm2064_vm0, %v1335_v32, 0.0  ;;  %v698_v32 = vsel %vm2067_vm3, %v1350_v37, 0.0  ;;  %v699_v33 = vsel %vm2069_vm4, %v2068_v0, 0.0 }
 0x140   : > { %v732_v35 = vadd.f32 %v696_v6, %v695_v48  ;;  %v702_v37 = vsel %vm2073_vm7, %v1362_v42, 0.0  ;;  %v735_v8 = vadd.f32 %v698_v32, %v697_v1  ;;  %vm2076_vm0 = vcmp.eq.s32.totalorder %v1444_v12, %v1553_v57 }
 0x141   : > { %v705_v42 = vsel %vm2076_vm0, %v1365_v43, 0.0  ;;  %vm2079_vm3 = vcmp.eq.s32.totalorder %v1440_v10, %v1555_v24  ;;  %vm2080_vm4 = vcmp.eq.s32.totalorder %v1448_v14, %v1553_v57  ;;  %vm2081_vm5 = vcmp.eq.s32.totalorder %v1448_v14, %v1555_v24 }
 0x142   : > { %v712_v10 = vsel %vm344_vm15, %v1392_v53, 0.0  ;;  %v715_v53 = vsel %vm347_vm13, %v1413_v61, 0.0 }
 0x145   : > { %668 = vadd.xlane.f32.xlu0 %v667_v39  ;;  %671 = vadd.xlane.f32.xlu1 %v670_v40  ;;  %v2060_v39 = vld [vmem:[#allocation5_spill] sm:$0xff]  ;;  %v2062_v40 = vld [vmem:[#allocation7_spill] sm:$0xff] }
 0x146   : > { %v691_v18 = vsel %vm323_vm6, %v2060_v39, 0.0  ;;  %v693_v28 = vsel %vm325_vm8, %v2062_v40, 0.0  ;;  %vm2072_vm6 = vcmp.eq.s32.totalorder %v1434_v7, %v1553_v57  ;;  %vm2074_vm8 = vcmp.eq.s32.totalorder %v1442_v11, %v1553_v57 }
 0x147   : > { %674 = vadd.xlane.f32.xlu2 %v673_v47  ;;  %v694_v47 = vsel %vm326_vm9, %v2063_v3, 0.0  ;;  %v726_v56 = vadd.f32 %v692_v27, %v691_v18  ;;  %v701_v36 = vsel %vm2072_vm6, %v1359_v41, 0.0  ;;  %v703_v9 = vsel %vm2074_vm8, %v1371_v45, 0.0 }
 0x148   : > { %v729_v29 = vadd.f32 %v694_v47, %v693_v28  ;;  %vm2075_vm9 = vcmp.eq.s32.totalorder %v1442_v11, %v1555_v24  ;;  %v706_v7 = vsel %vm2077_vm1, %v1368_v44, 0.0  ;;  %v707_v45 = vsel %vm2078_vm2, %v1383_v50, 0.0 }
 0x149   : > { %v704_v41 = vsel %vm2075_vm9, %v1374_v46, 0.0  ;;  %v708_v46 = vsel %vm2079_vm3, %v1386_v51, 0.0  ;;  %v709_v44 = vsel %vm2080_vm4, %v1395_v54, 0.0  ;;  %v710_v50 = vsel %vm2081_vm5, %v1398_v55, 0.0 }
 0x14a   : > { %v744_v11 = vadd.f32 %v704_v41, %v703_v9  ;;  %v750_v43 = vadd.f32 %v708_v46, %v707_v45  ;;  %v711_v51 = vsel %vm343_vm10, %v1389_v52, 0.0  ;;  %v713_v54 = vsel %vm345_vm14, %v1407_v59, 0.0  ;;  %v2083_v41 = vld [vmem:[#allocation11_spill] sm:$0xff] }
 0x14b   : > { %v714_v55 = vsel %vm346_vm11, %v1410_v60, 0.0  ;;  %v753_v12 = vadd.f32 %v710_v50, %v709_v44  ;;  %v756_v14 = vadd.f32 %v712_v10, %v711_v51  ;;  %v716_v59 = vsel %vm348_vm12, %v1416_v62, 0.0 }
 0x14c   : > { %v759_v52 = vadd.f32 %v714_v55, %v713_v54  ;;  %v762_v60 = vadd.f32 %v716_v59, %v715_v53  ;;  %vm813_vm10 = vcmask 7168   ;;  %v2086_v53 = vld [vmem:[#allocation14_spill] sm:$0xff] }
 0x14d   : > { %677 = vadd.xlane.f32.xlu0 %v676_v16  ;;  %680 = vadd.xlane.f32.xlu1 %v679_v21  ;;  %v738_v16 = vadd.f32 %v700_v34, %v699_v33  ;;  %v741_v21 = vadd.f32 %v702_v37, %v701_v36 }
 0x14f   : > { %683 = vadd.xlane.f32.xlu2 %v682_v22  ;;  %v747_v22 = vadd.f32 %v706_v7, %v705_v42 }
 0x155   : > { %718 = vadd.xlane.f32.xlu0 %v717_v2  ;;  %721 = vadd.xlane.f32.xlu1 %v720_v23 }
 0x157   : > { %724 = vadd.xlane.f32.xlu2 %v723_v17 }
 0x15d   : > { %727 = vadd.xlane.f32.xlu0 %v726_v56  ;;  %730 = vadd.xlane.f32.xlu1 %v729_v29 }
 0x15f   : > { %733 = vadd.xlane.f32.xlu2 %v732_v35 }
 0x165   : > { %736 = vadd.xlane.f32.xlu0 %v735_v8  ;;  %739 = vadd.xlane.f32.xlu1 %v738_v16 }
 0x167   : > { %742 = vadd.xlane.f32.xlu2 %v741_v21  ;;  %v2082_v21 = vld [vmem:[#allocation12_spill] sm:$0xff] }
 0x16d   : > { %745 = vadd.xlane.f32.xlu0 %v744_v11  ;;  %748 = vadd.xlane.f32.xlu1 %v747_v22  ;;  %v2084_v11 = vld [vmem:[#allocation15_spill] sm:$0xff] }
 0x16e   : > { %v498_v63 = vpop.xlane.xlu2 %497 }
 0x16f   : > { %751 = vadd.xlane.f32.xlu2 %v750_v43  ;;  %1069 = vlog2.f32 %v498_v63 }
 0x170   : > { %v495_v26 = vpop.xlane.xlu1 %494 }
 0x171   : > { %1071 = vlog2.f32 %v495_v26 }
 0x175   : > { %754 = vadd.xlane.f32.xlu0 %v753_v12  ;;  %757 = vadd.xlane.f32.xlu1 %v756_v14  ;;  %v1070_v1 = vpop.eup %1069 }
 0x176   : > { %v544_v34 = vmul.f32 0.6931472, %v1070_v1 }
 0x177   : > { %760 = vadd.xlane.f32.xlu2 %v759_v52  ;;  %v1072_v32 = vpop.eup %1071 }
 0x178   : > { %v501_v31 = vpop.xlane.xlu0 %500  ;;  %v504_v38 = vpop.xlane.xlu1 %503  ;;  %v542_v36 = vmul.f32 0.6931472, %v1072_v32  ;;  %v766_v42 = vadd.f32 %v544_v34, %v2083_v41  ;;  %v2090_v41 = vld [vmem:[#allocation19_spill] sm:$0xff] }
 0x179   : > { %1073 = vlog2.f32 %v501_v31  ;;  %v2085_v31 = vld [vmem:[#allocation13_spill] sm:$0xff] }
 0x17a   : > { %v507_v13 = vpop.xlane.xlu2 %506  ;;  %1075 = vlog2.f32 %v504_v38  ;;  %v765_v9 = vadd.f32 %v542_v36, %v2082_v21 }
 0x17b   : > { %1077 = vlog2.f32 %v507_v13 }
 0x17d   : > { %763 = vadd.xlane.f32.xlu0 %v762_v60 }
 0x17f   : > { %v1074_v0 = vpop.eup %1073 }
 0x180   : > { %v510_v15 = vpop.xlane.xlu0 %509  ;;  %v513_v19 = vpop.xlane.xlu1 %512  ;;  %v546_v8 = vmul.f32 0.6931472, %v1074_v0 }
 0x181   : > { %1079 = vlog2.f32 %v510_v15  ;;  %v1076_v16 = vpop.eup %1075 }
 0x182   : > { %v516_v20 = vpop.xlane.xlu2 %515  ;;  %v1078_v7 = vpop.eup %1077  ;;  %1081 = vlog2.f32 %v513_v19  ;;  %v767_v22 = vadd.f32 %v546_v8, %v2084_v11  ;;  %v548_v63 = vmul.f32 0.6931472, %v1076_v16  ;;  %v2087_v19 = vld [vmem:[#allocation16_spill] sm:$0xff]  ;;  %v2088_v8 = vld [vmem:[#allocation18_spill] sm:$0xff]  ;;  %v2089_v16 = vld [vmem:[#allocation17_spill] sm:$0xff] }
 0x183   : > { %1083 = vlog2.f32 %v516_v20  ;;  %v550_v50 = vmul.f32 0.6931472, %v1078_v7 }
 0x184   : > { %v768_v38 = vadd.f32 %v548_v63, %v2085_v31 }
 0x185   : > { %v769_v59 = vadd.f32 %v550_v50, %v2086_v53  ;;  %v2091_v50 = vld [vmem:[#allocation21_spill] sm:$0xff] }
 0x187   : > { %v1080_v43 = vpop.eup %1079 }
 0x188   : > { %v519_v2 = vpop.xlane.xlu0 %518  ;;  %v1877_v23 = vpop.xlane.xlu1 %521  ;;  %v552_v12 = vmul.f32 0.6931472, %v1080_v43 }
 0x189   : > { %1085 = vlog2.f32 %v519_v2  ;;  %v1082_v52 = vpop.eup %1081 }
 0x18a   : > { %v1879_v17 = vpop.xlane.xlu2 %524  ;;  %v1084_v13 = vpop.eup %1083  ;;  %1087 = vlog2.f32 %v1877_v23  ;;  %v770_v20 = vadd.f32 %v552_v12, %v2087_v19 }
 0x18b   : > { %1089 = vlog2.f32 %v1879_v17  ;;  %v556_v1 = vmul.f32 0.6931472, %v1084_v13 }
 0x18d   : > { %v772_v21 = vadd.f32 %v556_v1, %v2089_v16 }
 0x18f   : > { %v1086_v2 = vpop.eup %1085 }
 0x190   : > { %v1881_v39 = vpop.xlane.xlu0 %527  ;;  %v1883_v57 = vpop.xlane.xlu1 %530 }
 0x191   : > { %1091 = vlog2.f32 %v1881_v39  ;;  %v1088_v36 = vpop.eup %1087 }
 0x192   : > { %v1885_v61 = vpop.xlane.xlu2 %533  ;;  %1093 = vlog2.f32 %v1883_v57 }
 0x193   : > { %1095 = vlog2.f32 %v1885_v61 }
 0x198   : > { %v1887_v18 = vpop.xlane.xlu0 %536  ;;  %v1889_v62 = vpop.xlane.xlu1 %539 }
 0x199   : > { %1097 = vlog2.f32 %v1887_v18 }
 0x19a   : > { %v639_v30 = vpop.xlane.xlu2 %638  ;;  %1099 = vlog2.f32 %v1889_v62 }
 0x19b   : > { %v781_v45 = vmul.f32 %v765_v9, %v639_v30  ;;  %v554_v30 = vmul.f32 0.6931472, %v1082_v52  ;;  %v1090_v9 = vpop.eup %1089 }
 0x19c   : > { %v1092_v7 = vpop.eup %1091 }
 0x19d   : > { %v771_v17 = vadd.f32 %v554_v30, %v2088_v8 }
 0x1a0   : > { %v642_v24 = vpop.xlane.xlu0 %641  ;;  %v645_v5 = vpop.xlane.xlu1 %644 }
 0x1a1   : > { %v782_v46 = vmul.f32 %v766_v42, %v642_v24  ;;  %v783_v51 = vmul.f32 %v767_v22, %v645_v5  ;;  %v562_v22 = vmul.f32 0.6931472, %v1090_v9 }
 0x1a2   : > { %v648_v27 = vpop.xlane.xlu2 %647 }
 0x1a3   : > { %v784_v60 = vmul.f32 %v768_v38, %v648_v27  ;;  %v558_v27 = vmul.f32 0.6931472, %v1086_v2 }
 0x1a5   : > { %v773_v42 = vadd.f32 %v558_v27, %v2090_v41 }
 0x1a8   : > { %v651_v40 = vpop.xlane.xlu0 %650  ;;  %v1891_v28 = vpop.xlane.xlu1 %653 }
 0x1a9   : > { %v785_v15 = vmul.f32 %v769_v59, %v651_v40  ;;  %v786_v32 = vmul.f32 %v770_v20, %v1891_v28  ;;  %v2094_v20 = vld [vmem:[#allocation23_spill] sm:$0xff] }
 0x1aa   : > { %v1893_v3 = vpop.xlane.xlu2 %656 }
 0x1ab   : > { %v787_v39 = vmul.f32 %v771_v17, %v1893_v3 }
 0x1b0   : > { %v1895_v47 = vpop.xlane.xlu0 %659  ;;  %v1897_v48 = vpop.xlane.xlu1 %662 }
 0x1b1   : > { %v788_v28 = vmul.f32 %v772_v21, %v1895_v47  ;;  %v789_v43 = vmul.f32 %v773_v42, %v1897_v48 }
 0x1b2   : > { %v1899_v6 = vpop.xlane.xlu2 %665 }
 0x1b8   : > { %v1901_v56 = vpop.xlane.xlu0 %668  ;;  %v1903_v29 = vpop.xlane.xlu1 %671 }
 0x1ba   : > { %v1905_v35 = vpop.xlane.xlu2 %674 }
 0x1c0   : > { %v1907_v33 = vpop.xlane.xlu0 %677  ;;  %v1909_v4 = vpop.xlane.xlu1 %680 }
 0x1c2   : > { %v1911_v37 = vpop.xlane.xlu2 %683 }
 0x1c8   : > { %v719_v26 = vpop.xlane.xlu0 %718  ;;  %v722_v44 = vpop.xlane.xlu1 %721 }
 0x1c9   : > { %v797_v10 = vsub.f32 %v781_v45, %v719_v26  ;;  %v798_v54 = vsub.f32 %v782_v46, %v722_v44  ;;  %v560_v45 = vmul.f32 0.6931472, %v1088_v36  ;;  %v564_v26 = vmul.f32 0.6931472, %v1092_v7  ;;  %v1094_v44 = vpop.eup %1093 }
 0x1ca   : > { %v725_v55 = vpop.xlane.xlu2 %724  ;;  %v1096_v48 = vpop.eup %1095  ;;  %v566_v52 = vmul.f32 0.6931472, %v1094_v44 }
 0x1cb   : > { %814 = vst.msk [vmem:[%s1921_s6] sm:$0xff] %vm813_vm10, %v797_v10  ;;  %v799_v14 = vsub.f32 %v783_v51, %v725_v55  ;;  %v774_v61 = vadd.f32 %v560_v45, %v2091_v50  ;;  %v2092_v51 = vld [vmem:[#allocation20_spill] sm:$0xff]  ;;  %v2093_v55 = vld [vmem:[#allocation22_spill] sm:$0xff]  ;;  %v568_v53 = vmul.f32 0.6931472, %v1096_v48 }
 0x1cc   : > { %815 = vst.msk [vmem:[%s1921_s6 + $0x8] sm:$0xff] %vm813_vm10, %v798_v54  ;;  %v775_v10 = vadd.f32 %v562_v22, %v2092_v51  ;;  %v776_v12 = vadd.f32 %v564_v26, %v2093_v55 }
 0x1cd   : > { %816 = vst.msk [vmem:[%s1921_s6 + $0x10] sm:$0xff] %vm813_vm10, %v799_v14  ;;  %v790_v54 = vmul.f32 %v774_v61, %v1899_v6  ;;  %v1098_v14 = vpop.eup %1097  ;;  %v778_v62 = vadd.f32 %v568_v53, %v2094_v20 }
 0x1ce   : > { %v791_v18 = vmul.f32 %v775_v10, %v1901_v56  ;;  %v792_v59 = vmul.f32 %v776_v12, %v1903_v29  ;;  %v570_v19 = vmul.f32 0.6931472, %v1098_v14  ;;  %v777_v56 = vadd.f32 %v566_v52, %v1528_v49  ;;  %v1100_v2 = vpop.eup %1099 }
 0x1cf   : > { %v794_v30 = vmul.f32 %v778_v62, %v1907_v33 }
 0x1d0   : > { %v728_v24 = vpop.xlane.xlu0 %727  ;;  %v731_v5 = vpop.xlane.xlu1 %730  ;;  %v793_v29 = vmul.f32 %v777_v56, %v1905_v35 }
 0x1d1   : > { %v800_v0 = vsub.f32 %v784_v60, %v728_v24  ;;  %v801_v34 = vsub.f32 %v785_v15, %v731_v5  ;;  %v779_v24 = vadd.f32 %v570_v19, %v1538_v25 }
 0x1d2   : > { %v734_v23 = vpop.xlane.xlu2 %733 }
 0x1d3   : > { %817 = vst.msk [vmem:[%s1921_s6 + $0x18] sm:$0xff] %vm813_vm10, %v800_v0  ;;  %v802_v40 = vsub.f32 %v786_v32, %v734_v23  ;;  %v572_v32 = vmul.f32 0.6931472, %v1100_v2  ;;  %v795_v0 = vmul.f32 %v779_v24, %v1909_v4 }
 0x1d4   : > { %818 = vst.msk [vmem:[%s1921_s6 + $0x20] sm:$0xff] %vm813_vm10, %v801_v34 }
 0x1d5   : > { %819 = vst.msk [vmem:[%s1921_s6 + $0x28] sm:$0xff] %vm813_vm10, %v802_v40  ;;  %v780_v35 = vadd.f32 %v572_v32, %v1544_v58 }
 0x1d7   : > { %v796_v25 = vmul.f32 %v780_v35, %v1911_v37 }
 0x1d8   : > { %v737_v46 = vpop.xlane.xlu0 %736  ;;  %v740_v11 = vpop.xlane.xlu1 %739 }
 0x1d9   : > { %v803_v63 = vsub.f32 %v787_v39, %v737_v46  ;;  %v804_v57 = vsub.f32 %v788_v28, %v740_v11 }
 0x1da   : > { %v743_v3 = vpop.xlane.xlu2 %742 }
 0x1db   : > { %820 = vst.msk [vmem:[%s1921_s6 + $0x30] sm:$0xff] %vm813_vm10, %v803_v63  ;;  %v805_v47 = vsub.f32 %v789_v43, %v743_v3 }
 0x1dc   : > { %821 = vst.msk [vmem:[%s1921_s6 + $0x38] sm:$0xff] %vm813_vm10, %v804_v57 }
 0x1dd   : > { %822 = vst.msk [vmem:[%s1921_s6 + $0x40] sm:$0xff] %vm813_vm10, %v805_v47 }
 0x1e0   : > { %v746_v31 = vpop.xlane.xlu0 %745  ;;  %v749_v38 = vpop.xlane.xlu1 %748 }
 0x1e1   : > { %v806_v13 = vsub.f32 %v790_v54, %v746_v31  ;;  %v807_v60 = vsub.f32 %v791_v18, %v749_v38 }
 0x1e2   : > { %v752_v15 = vpop.xlane.xlu2 %751 }
 0x1e3   : > { %823 = vst.msk [vmem:[%s1921_s6 + $0x48] sm:$0xff] %vm813_vm10, %v806_v13  ;;  %v808_v6 = vsub.f32 %v792_v59, %v752_v15 }
 0x1e4   : > { %824 = vst.msk [vmem:[%s1921_s6 + $0x50] sm:$0xff] %vm813_vm10, %v807_v60 }
 0x1e5   : > { %825 = vst.msk [vmem:[%s1921_s6 + $0x58] sm:$0xff] %vm813_vm10, %v808_v6 }
 0x1e8   : > { %v755_v5 = vpop.xlane.xlu0 %754  ;;  %v758_v1 = vpop.xlane.xlu1 %757 }
 0x1e9   : > { %v809_v49 = vsub.f32 %v793_v29, %v755_v5  ;;  %v810_v34 = vsub.f32 %v794_v30, %v758_v1 }
 0x1ea   : > { %v761_v23 = vpop.xlane.xlu2 %760 }
 0x1eb   : > { %826 = vst.msk [vmem:[%s1921_s6 + $0x60] sm:$0xff] %vm813_vm10, %v809_v49  ;;  %v811_v27 = vsub.f32 %v795_v0, %v761_v23 }
 0x1ec   : > { %827 = vst.msk [vmem:[%s1921_s6 + $0x68] sm:$0xff] %vm813_vm10, %v810_v34 }
 0x1ed   : > { %828 = vst.msk [vmem:[%s1921_s6 + $0x70] sm:$0xff] %vm813_vm10, %v811_v27 }
 0x1f0   : > { %v764_v33 = vpop.xlane.xlu0 %763 }
 0x1f1   : > { %v812_v40 = vsub.f32 %v796_v25, %v764_v33 }
 0x1f3   : > { %829 = vst.msk [vmem:[%s1921_s6 + $0x78] sm:$0xff] %vm813_vm10, %v812_v40 }
 0x1f4 PF: > { %p13_p7 = scmp.ge.s32.totalorder %s1211_s17, 4   ;;  %s2095_s12 = smov %s1157_s13 }
 0x1f5   : > { %s2096_s13 = smov %s1161_s14  ;;  %s2097_s14 = smov %s1221_s20 }
 0x1f6   : > { %s2098_s15 = smov %s1211_s17  ;;  %15 = sbr.rel (!%p13_p7) target bundleno = 3 (0x3), region = 75 }
 0x1fb   :  { %852 = vsyncpa [#allocation3], 1 }
 0x1fc   :  { %854 = vsyncpa [#allocation3 + $0x1], 1 }

</bundles_post_ra>
